<compile_context>
chip_gen: v7x
topology: tpu7x:2x2x1
jax: 0.10.0
libtpu: 0.0.40
codegen_flags: <defaults>
</compile_context>

<pallas_src>
import functools

import jax
import jax.numpy as jnp
from jax.experimental import pallas as pl
from jax.experimental.pallas import tpu as pltpu

# Layer widths of the autoencoder (encoder then decoder).
DIMS = [200, 128, 64, 32, 16, 12, 16, 32, 64, 128, 200]
N_LAYERS = len(DIMS) - 1  # 10 Linear+ReLU layers


def _round_up(x, m):
    return ((x + m - 1) // m) * m


def _ae_kernel(x_ref, *refs):
    """refs = (w1, b1, w2, b2, ..., w10, b10, out_ref).

    x_ref: (bm, 200) f32 batch tile (cast to bf16 in-kernel).
    w_i:   (in, out) bf16, whole array resident in VMEM.
    b_i:   (1, out)  f32, whole array resident in VMEM.
    """
    out_ref = refs[-1]
    param_refs = refs[:-1]

    # f32 -> bf16 cast on the VPU (huge slack here); avoids a separate wrapper
    # cast op that would double the input HBM traffic.
    h = x_ref[...].astype(jnp.bfloat16)
    for li in range(N_LAYERS):
        w = param_refs[2 * li][...]        # (d_in, d_out) bf16
        b = param_refs[2 * li + 1][...]    # (1, d_out)    f32
        a = jnp.dot(h, w, preferred_element_type=jnp.float32) + b
        a = jnp.maximum(a, 0.0)            # ReLU after every Linear (incl. last,
                                           # matching the PyTorch module)
        # Keep activations bf16 between layers (MXU-native); last layer stays f32.
        h = a if li == N_LAYERS - 1 else a.astype(jnp.bfloat16)
    out_ref[...] = h.astype(out_ref.dtype)


@functools.partial(jax.jit, static_argnames=("bm",))
def autoencoder_forward(x, params, *, bm=2048):
    """x: (N, 200) f32. params: list of (W_t, b) with W_t shape (in, out), b (1, out)."""
    n, f_in = x.shape
    assert f_in == DIMS[0]

    # Batch tile:
    #   * default 2048 (multiple of 256 / 128 for all MXU generations),
    #   * at most ceil(n/2) rounded up to 256 so the grid has >= 2 steps and the
    #     "parallel" batch axis can shard across both v7x TensorCores,
    #   * never (much) larger than the batch itself for tiny inputs.
    bm_eff = min(bm,
                 _round_up(max((n + 1) // 2, 1), 256),
                 _round_up(n, 8))
    bm_eff = max(bm_eff, 8)
    grid = (pl.cdiv(n, bm_eff),)   # partial edge block handled by Pallas masking

    # bf16 weights (MXU-native), f32 biases (added to the f32 accumulator).
    # One-time, tiny (~150 KiB total) conversions.
    flat_params = []
    for w, b in params:
        flat_params.append(w.astype(jnp.bfloat16))
        flat_params.append(b.astype(jnp.float32))

    x_spec = pl.BlockSpec((bm_eff, DIMS[0]), lambda i: (i, 0))
    out_spec = pl.BlockSpec((bm_eff, DIMS[-1]), lambda i: (i, 0))
    # All params live whole in VMEM for the entire kernel: single up-front DMA,
    # no per-step bookkeeping or double buffering for the 20 small operands.
    param_specs = [pl.BlockSpec(memory_space=pltpu.MemorySpace.VMEM)
                   for _ in range(2 * N_LAYERS)]

    out = pl.pallas_call(
        _ae_kernel,
        out_shape=jax.ShapeDtypeStruct((n, DIMS[-1]), jnp.float32),
        grid=grid,
        in_specs=[x_spec] + param_specs,
        out_specs=out_spec,
        compiler_params=pltpu.CompilerParams(
            dimension_semantics=("parallel",),   # batch axis shards over TCs (v7x)
            vmem_limit_bytes=32 * 1024 * 1024,   # few-MiB footprint; ample headroom
        ),
    )(x, *flat_params)

    return out


def init_params(key):
    """Deterministic init matching the nn.Linear shapes (stored transposed, f32)."""
    params = []
    for li in range(N_LAYERS):
        d_in, d_out = DIMS[li], DIMS[li + 1]
        key, kw, kb = jax.random.split(key, 3)
        bound = 1.0 / jnp.sqrt(jnp.float32(d_in))
        # PyTorch Linear weight is (out, in); we keep it transposed as (in, out).
        w_t = jax.random.uniform(kw, (d_in, d_out), jnp.float32, -bound, bound)
        b = jax.random.uniform(kb, (1, d_out), jnp.float32, -bound, bound)
        params.append((w_t, b))
    return params


def reference_forward(x, params):
    """Pure-JAX reference mimicking the kernel's bf16 compute / f32 accumulation."""
    h = x.astype(jnp.bfloat16)
    for li, (w, b) in enumerate(params):
        a = jnp.dot(h, w.astype(jnp.bfloat16), preferred_element_type=jnp.float32)
        a = jnp.maximum(a + b.astype(jnp.float32), 0.0)
        h = a if li == len(params) - 1 else a.astype(jnp.bfloat16)
    return h.astype(jnp.float32)


if __name__ == "__main__":
    key = jax.random.PRNGKey(0)
    key, kx1, kx2 = jax.random.split(key, 3)
    params = init_params(key)

    # Small batch (not a multiple of any tile size).
    batch = 16
    x = jax.random.normal(kx1, (batch, DIMS[0]), jnp.float32)
    out = jax.block_until_ready(autoencoder_forward(x, params))
    ref = reference_forward(x, params)
    assert out.shape == (batch, DIMS[-1])
    assert out.dtype == jnp.float32
    max_err = float(jnp.max(jnp.abs(out - ref)))
    assert jnp.allclose(out, ref, atol=2e-2, rtol=2e-2), f"max_err={max_err}"

    # Slightly larger batch: exercises a multi-step grid with a partial edge
    # block (no wrapper-side pad/slice).
    batch2 = 300
    x2 = jax.random.normal(kx2, (batch2, DIMS[0]), jnp.float32)
    out2 = jax.block_until_ready(autoencoder_forward(x2, params))
    ref2 = reference_forward(x2, params)
    assert out2.shape == (batch2, DIMS[-1])
    max_err2 = float(jnp.max(jnp.abs(out2 - ref2)))
    assert jnp.allclose(out2, ref2, atol=2e-2, rtol=2e-2), f"max_err={max_err2}"

    print("KERNEL_OK")
</pallas_src>

<mosaic_0001>
module attributes {stable_mosaic.version = 11 : i64} {
  func.func @_ae_kernel(%arg0: i32, %arg1: memref<16x200xf32, #tpu.memory_space<vmem>>, %arg2: memref<200x128xbf16, #tpu.memory_space<vmem>>, %arg3: memref<1x128xf32, #tpu.memory_space<vmem>>, %arg4: memref<128x64xbf16, #tpu.memory_space<vmem>>, %arg5: memref<1x64xf32, #tpu.memory_space<vmem>>, %arg6: memref<64x32xbf16, #tpu.memory_space<vmem>>, %arg7: memref<1x32xf32, #tpu.memory_space<vmem>>, %arg8: memref<32x16xbf16, #tpu.memory_space<vmem>>, %arg9: memref<1x16xf32, #tpu.memory_space<vmem>>, %arg10: memref<16x12xbf16, #tpu.memory_space<vmem>>, %arg11: memref<1x12xf32, #tpu.memory_space<vmem>>, %arg12: memref<12x16xbf16, #tpu.memory_space<vmem>>, %arg13: memref<1x16xf32, #tpu.memory_space<vmem>>, %arg14: memref<16x32xbf16, #tpu.memory_space<vmem>>, %arg15: memref<1x32xf32, #tpu.memory_space<vmem>>, %arg16: memref<32x64xbf16, #tpu.memory_space<vmem>>, %arg17: memref<1x64xf32, #tpu.memory_space<vmem>>, %arg18: memref<64x128xbf16, #tpu.memory_space<vmem>>, %arg19: memref<1x128xf32, #tpu.memory_space<vmem>>, %arg20: memref<128x200xbf16, #tpu.memory_space<vmem>>, %arg21: memref<1x200xf32, #tpu.memory_space<vmem>>, %arg22: memref<16x200xf32, #tpu.memory_space<vmem>>) attributes {dimension_semantics = [#tpu.dimension_semantics<parallel>], iteration_bounds = array<i64: 1>, scalar_prefetch = 0 : i64, scratch_operands = 0 : i64, tpu.core_type = #tpu.core_type<tc>, window_params = [{transform_indices = @transform_0, window_bounds = array<i64: 16, 200>}, {pipeline_mode = #tpu.pipeline_mode<synchronous>, transform_indices = @transform_1, window_bounds = array<i64: 200, 128>}, {pipeline_mode = #tpu.pipeline_mode<synchronous>, transform_indices = @transform_2, window_bounds = array<i64: 1, 128>}, {pipeline_mode = #tpu.pipeline_mode<synchronous>, transform_indices = @transform_3, window_bounds = array<i64: 128, 64>}, {pipeline_mode = #tpu.pipeline_mode<synchronous>, transform_indices = @transform_4, window_bounds = array<i64: 1, 64>}, {pipeline_mode = #tpu.pipeline_mode<synchronous>, transform_indices = @transform_5, window_bounds = array<i64: 64, 32>}, {pipeline_mode = #tpu.pipeline_mode<synchronous>, transform_indices = @transform_6, window_bounds = array<i64: 1, 32>}, {pipeline_mode = #tpu.pipeline_mode<synchronous>, transform_indices = @transform_7, window_bounds = array<i64: 32, 16>}, {pipeline_mode = #tpu.pipeline_mode<synchronous>, transform_indices = @transform_8, window_bounds = array<i64: 1, 16>}, {pipeline_mode = #tpu.pipeline_mode<synchronous>, transform_indices = @transform_9, window_bounds = array<i64: 16, 12>}, {pipeline_mode = #tpu.pipeline_mode<synchronous>, transform_indices = @transform_10, window_bounds = array<i64: 1, 12>}, {pipeline_mode = #tpu.pipeline_mode<synchronous>, transform_indices = @transform_11, window_bounds = array<i64: 12, 16>}, {pipeline_mode = #tpu.pipeline_mode<synchronous>, transform_indices = @transform_12, window_bounds = array<i64: 1, 16>}, {pipeline_mode = #tpu.pipeline_mode<synchronous>, transform_indices = @transform_13, window_bounds = array<i64: 16, 32>}, {pipeline_mode = #tpu.pipeline_mode<synchronous>, transform_indices = @transform_14, window_bounds = array<i64: 1, 32>}, {pipeline_mode = #tpu.pipeline_mode<synchronous>, transform_indices = @transform_15, window_bounds = array<i64: 32, 64>}, {pipeline_mode = #tpu.pipeline_mode<synchronous>, transform_indices = @transform_16, window_bounds = array<i64: 1, 64>}, {pipeline_mode = #tpu.pipeline_mode<synchronous>, transform_indices = @transform_17, window_bounds = array<i64: 64, 128>}, {pipeline_mode = #tpu.pipeline_mode<synchronous>, transform_indices = @transform_18, window_bounds = array<i64: 1, 128>}, {pipeline_mode = #tpu.pipeline_mode<synchronous>, transform_indices = @transform_19, window_bounds = array<i64: 128, 200>}, {pipeline_mode = #tpu.pipeline_mode<synchronous>, transform_indices = @transform_20, window_bounds = array<i64: 1, 200>}, {transform_indices = @transform_21, window_bounds = array<i64: 16, 200>}]} {
    %c0 = arith.constant 0 : index
    %c0_0 = arith.constant 0 : index
    %0 = vector.load %arg1[%c0, %c0_0] : memref<16x200xf32, #tpu.memory_space<vmem>>, vector<16x200xf32>
    %1 = arith.truncf %0 : vector<16x200xf32> to vector<16x200xbf16>
    %c0_1 = arith.constant 0 : index
    %c0_2 = arith.constant 0 : index
    %2 = vector.load %arg2[%c0_1, %c0_2] : memref<200x128xbf16, #tpu.memory_space<vmem>>, vector<200x128xbf16>
    %c0_3 = arith.constant 0 : index
    %c0_4 = arith.constant 0 : index
    %3 = vector.load %arg3[%c0_3, %c0_4] : memref<1x128xf32, #tpu.memory_space<vmem>>, vector<1x128xf32>
    %cst = arith.constant dense<0.000000e+00> : vector<16x128xf32>
    %4 = tpu.matmul %1, %2, %cst {dimension_numbers = #tpu.dot_dimension_numbers<[1], [0], [0], [1], [0, 0, 1, 1], [], []>} : vector<16x200xbf16>, vector<200x128xbf16>, vector<16x128xf32> -> vector<16x128xf32>
    %5 = vector.broadcast %3 : vector<1x128xf32> to vector<16x128xf32>
    %6 = arith.addf %4, %5 : vector<16x128xf32>
    %cst_5 = arith.constant 0.000000e+00 : f32
    %7 = vector.broadcast %cst_5 : f32 to vector<16x128xf32>
    %8 = arith.maximumf %6, %7 : vector<16x128xf32>
    %9 = arith.truncf %8 : vector<16x128xf32> to vector<16x128xbf16>
    %c0_6 = arith.constant 0 : index
    %c0_7 = arith.constant 0 : index
    %10 = vector.load %arg4[%c0_6, %c0_7] : memref<128x64xbf16, #tpu.memory_space<vmem>>, vector<128x64xbf16>
    %c0_8 = arith.constant 0 : index
    %c0_9 = arith.constant 0 : index
    %11 = vector.load %arg5[%c0_8, %c0_9] : memref<1x64xf32, #tpu.memory_space<vmem>>, vector<1x64xf32>
    %cst_10 = arith.constant dense<0.000000e+00> : vector<16x64xf32>
    %12 = tpu.matmul %9, %10, %cst_10 {dimension_numbers = #tpu.dot_dimension_numbers<[1], [0], [0], [1], [0, 0, 1, 1], [], []>} : vector<16x128xbf16>, vector<128x64xbf16>, vector<16x64xf32> -> vector<16x64xf32>
    %13 = vector.broadcast %11 : vector<1x64xf32> to vector<16x64xf32>
    %14 = arith.addf %12, %13 : vector<16x64xf32>
    %cst_11 = arith.constant 0.000000e+00 : f32
    %15 = vector.broadcast %cst_11 : f32 to vector<16x64xf32>
    %16 = arith.maximumf %14, %15 : vector<16x64xf32>
    %17 = arith.truncf %16 : vector<16x64xf32> to vector<16x64xbf16>
    %c0_12 = arith.constant 0 : index
    %c0_13 = arith.constant 0 : index
    %18 = vector.load %arg6[%c0_12, %c0_13] : memref<64x32xbf16, #tpu.memory_space<vmem>>, vector<64x32xbf16>
    %c0_14 = arith.constant 0 : index
    %c0_15 = arith.constant 0 : index
    %19 = vector.load %arg7[%c0_14, %c0_15] : memref<1x32xf32, #tpu.memory_space<vmem>>, vector<1x32xf32>
    %cst_16 = arith.constant dense<0.000000e+00> : vector<16x32xf32>
    %20 = tpu.matmul %17, %18, %cst_16 {dimension_numbers = #tpu.dot_dimension_numbers<[1], [0], [0], [1], [0, 0, 1, 1], [], []>} : vector<16x64xbf16>, vector<64x32xbf16>, vector<16x32xf32> -> vector<16x32xf32>
    %21 = vector.broadcast %19 : vector<1x32xf32> to vector<16x32xf32>
    %22 = arith.addf %20, %21 : vector<16x32xf32>
    %cst_17 = arith.constant 0.000000e+00 : f32
    %23 = vector.broadcast %cst_17 : f32 to vector<16x32xf32>
    %24 = arith.maximumf %22, %23 : vector<16x32xf32>
    %25 = arith.truncf %24 : vector<16x32xf32> to vector<16x32xbf16>
    %c0_18 = arith.constant 0 : index
    %c0_19 = arith.constant 0 : index
    %26 = vector.load %arg8[%c0_18, %c0_19] : memref<32x16xbf16, #tpu.memory_space<vmem>>, vector<32x16xbf16>
    %c0_20 = arith.constant 0 : index
    %c0_21 = arith.constant 0 : index
    %27 = vector.load %arg9[%c0_20, %c0_21] : memref<1x16xf32, #tpu.memory_space<vmem>>, vector<1x16xf32>
    %cst_22 = arith.constant dense<0.000000e+00> : vector<16x16xf32>
    %28 = tpu.matmul %25, %26, %cst_22 {dimension_numbers = #tpu.dot_dimension_numbers<[1], [0], [0], [1], [0, 0, 1, 1], [], []>} : vector<16x32xbf16>, vector<32x16xbf16>, vector<16x16xf32> -> vector<16x16xf32>
    %29 = vector.broadcast %27 : vector<1x16xf32> to vector<16x16xf32>
    %30 = arith.addf %28, %29 : vector<16x16xf32>
    %cst_23 = arith.constant 0.000000e+00 : f32
    %31 = vector.broadcast %cst_23 : f32 to vector<16x16xf32>
    %32 = arith.maximumf %30, %31 : vector<16x16xf32>
    %33 = arith.truncf %32 : vector<16x16xf32> to vector<16x16xbf16>
    %c0_24 = arith.constant 0 : index
    %c0_25 = arith.constant 0 : index
    %34 = vector.load %arg10[%c0_24, %c0_25] : memref<16x12xbf16, #tpu.memory_space<vmem>>, vector<16x12xbf16>
    %c0_26 = arith.constant 0 : index
    %c0_27 = arith.constant 0 : index
    %35 = vector.load %arg11[%c0_26, %c0_27] : memref<1x12xf32, #tpu.memory_space<vmem>>, vector<1x12xf32>
    %cst_28 = arith.constant dense<0.000000e+00> : vector<16x12xf32>
    %36 = tpu.matmul %33, %34, %cst_28 {dimension_numbers = #tpu.dot_dimension_numbers<[1], [0], [0], [1], [0, 0, 1, 1], [], []>} : vector<16x16xbf16>, vector<16x12xbf16>, vector<16x12xf32> -> vector<16x12xf32>
    %37 = vector.broadcast %35 : vector<1x12xf32> to vector<16x12xf32>
    %38 = arith.addf %36, %37 : vector<16x12xf32>
    %cst_29 = arith.constant 0.000000e+00 : f32
    %39 = vector.broadcast %cst_29 : f32 to vector<16x12xf32>
    %40 = arith.maximumf %38, %39 : vector<16x12xf32>
    %41 = arith.truncf %40 : vector<16x12xf32> to vector<16x12xbf16>
    %c0_30 = arith.constant 0 : index
    %c0_31 = arith.constant 0 : index
    %42 = vector.load %arg12[%c0_30, %c0_31] : memref<12x16xbf16, #tpu.memory_space<vmem>>, vector<12x16xbf16>
    %c0_32 = arith.constant 0 : index
    %c0_33 = arith.constant 0 : index
    %43 = vector.load %arg13[%c0_32, %c0_33] : memref<1x16xf32, #tpu.memory_space<vmem>>, vector<1x16xf32>
    %cst_34 = arith.constant dense<0.000000e+00> : vector<16x16xf32>
    %44 = tpu.matmul %41, %42, %cst_34 {dimension_numbers = #tpu.dot_dimension_numbers<[1], [0], [0], [1], [0, 0, 1, 1], [], []>} : vector<16x12xbf16>, vector<12x16xbf16>, vector<16x16xf32> -> vector<16x16xf32>
    %45 = vector.broadcast %43 : vector<1x16xf32> to vector<16x16xf32>
    %46 = arith.addf %44, %45 : vector<16x16xf32>
    %cst_35 = arith.constant 0.000000e+00 : f32
    %47 = vector.broadcast %cst_35 : f32 to vector<16x16xf32>
    %48 = arith.maximumf %46, %47 : vector<16x16xf32>
    %49 = arith.truncf %48 : vector<16x16xf32> to vector<16x16xbf16>
    %c0_36 = arith.constant 0 : index
    %c0_37 = arith.constant 0 : index
    %50 = vector.load %arg14[%c0_36, %c0_37] : memref<16x32xbf16, #tpu.memory_space<vmem>>, vector<16x32xbf16>
    %c0_38 = arith.constant 0 : index
    %c0_39 = arith.constant 0 : index
    %51 = vector.load %arg15[%c0_38, %c0_39] : memref<1x32xf32, #tpu.memory_space<vmem>>, vector<1x32xf32>
    %cst_40 = arith.constant dense<0.000000e+00> : vector<16x32xf32>
    %52 = tpu.matmul %49, %50, %cst_40 {dimension_numbers = #tpu.dot_dimension_numbers<[1], [0], [0], [1], [0, 0, 1, 1], [], []>} : vector<16x16xbf16>, vector<16x32xbf16>, vector<16x32xf32> -> vector<16x32xf32>
    %53 = vector.broadcast %51 : vector<1x32xf32> to vector<16x32xf32>
    %54 = arith.addf %52, %53 : vector<16x32xf32>
    %cst_41 = arith.constant 0.000000e+00 : f32
    %55 = vector.broadcast %cst_41 : f32 to vector<16x32xf32>
    %56 = arith.maximumf %54, %55 : vector<16x32xf32>
    %57 = arith.truncf %56 : vector<16x32xf32> to vector<16x32xbf16>
    %c0_42 = arith.constant 0 : index
    %c0_43 = arith.constant 0 : index
    %58 = vector.load %arg16[%c0_42, %c0_43] : memref<32x64xbf16, #tpu.memory_space<vmem>>, vector<32x64xbf16>
    %c0_44 = arith.constant 0 : index
    %c0_45 = arith.constant 0 : index
    %59 = vector.load %arg17[%c0_44, %c0_45] : memref<1x64xf32, #tpu.memory_space<vmem>>, vector<1x64xf32>
    %cst_46 = arith.constant dense<0.000000e+00> : vector<16x64xf32>
    %60 = tpu.matmul %57, %58, %cst_46 {dimension_numbers = #tpu.dot_dimension_numbers<[1], [0], [0], [1], [0, 0, 1, 1], [], []>} : vector<16x32xbf16>, vector<32x64xbf16>, vector<16x64xf32> -> vector<16x64xf32>
    %61 = vector.broadcast %59 : vector<1x64xf32> to vector<16x64xf32>
    %62 = arith.addf %60, %61 : vector<16x64xf32>
    %cst_47 = arith.constant 0.000000e+00 : f32
    %63 = vector.broadcast %cst_47 : f32 to vector<16x64xf32>
    %64 = arith.maximumf %62, %63 : vector<16x64xf32>
    %65 = arith.truncf %64 : vector<16x64xf32> to vector<16x64xbf16>
    %c0_48 = arith.constant 0 : index
    %c0_49 = arith.constant 0 : index
    %66 = vector.load %arg18[%c0_48, %c0_49] : memref<64x128xbf16, #tpu.memory_space<vmem>>, vector<64x128xbf16>
    %c0_50 = arith.constant 0 : index
    %c0_51 = arith.constant 0 : index
    %67 = vector.load %arg19[%c0_50, %c0_51] : memref<1x128xf32, #tpu.memory_space<vmem>>, vector<1x128xf32>
    %cst_52 = arith.constant dense<0.000000e+00> : vector<16x128xf32>
    %68 = tpu.matmul %65, %66, %cst_52 {dimension_numbers = #tpu.dot_dimension_numbers<[1], [0], [0], [1], [0, 0, 1, 1], [], []>} : vector<16x64xbf16>, vector<64x128xbf16>, vector<16x128xf32> -> vector<16x128xf32>
    %69 = vector.broadcast %67 : vector<1x128xf32> to vector<16x128xf32>
    %70 = arith.addf %68, %69 : vector<16x128xf32>
    %cst_53 = arith.constant 0.000000e+00 : f32
    %71 = vector.broadcast %cst_53 : f32 to vector<16x128xf32>
    %72 = arith.maximumf %70, %71 : vector<16x128xf32>
    %73 = arith.truncf %72 : vector<16x128xf32> to vector<16x128xbf16>
    %c0_54 = arith.constant 0 : index
    %c0_55 = arith.constant 0 : index
    %74 = vector.load %arg20[%c0_54, %c0_55] : memref<128x200xbf16, #tpu.memory_space<vmem>>, vector<128x200xbf16>
    %c0_56 = arith.constant 0 : index
    %c0_57 = arith.constant 0 : index
    %75 = vector.load %arg21[%c0_56, %c0_57] : memref<1x200xf32, #tpu.memory_space<vmem>>, vector<1x200xf32>
    %cst_58 = arith.constant dense<0.000000e+00> : vector<16x200xf32>
    %76 = tpu.matmul %73, %74, %cst_58 {dimension_numbers = #tpu.dot_dimension_numbers<[1], [0], [0], [1], [0, 0, 1, 1], [], []>} : vector<16x128xbf16>, vector<128x200xbf16>, vector<16x200xf32> -> vector<16x200xf32>
    %77 = vector.broadcast %75 : vector<1x200xf32> to vector<16x200xf32>
    %78 = arith.addf %76, %77 : vector<16x200xf32>
    %cst_59 = arith.constant 0.000000e+00 : f32
    %79 = vector.broadcast %cst_59 : f32 to vector<16x200xf32>
    %80 = arith.maximumf %78, %79 : vector<16x200xf32>
    %c0_60 = arith.constant 0 : index
    %c0_61 = arith.constant 0 : index
    %81 = vector.load %arg22[%c0_60, %c0_61] : memref<16x200xf32, #tpu.memory_space<vmem>>, vector<16x200xf32>
    tpu.vector_store %arg22[%c0_60, %c0_61], %80 {strides = array<i32>} : memref<16x200xf32, #tpu.memory_space<vmem>>, vector<16x200xf32>,
    return
  }
  func.func @transform_0(%arg0: i32) -> (i32, i32) {
    %c0_i32 = arith.constant 0 : i32
    %c0_i32_0 = arith.constant 0 : i32
    return %arg0, %c0_i32 : i32, i32
  }
  func.func @transform_1(%arg0: i32) -> (i32, i32) {
    %c0_i32 = arith.constant 0 : i32
    %c0_i32_0 = arith.constant 0 : i32
    %c0_i32_1 = arith.constant 0 : i32
    return %c0_i32, %c0_i32_0 : i32, i32
  }
  func.func @transform_2(%arg0: i32) -> (i32, i32) {
    %c0_i32 = arith.constant 0 : i32
    %c0_i32_0 = arith.constant 0 : i32
    %c0_i32_1 = arith.constant 0 : i32
    return %c0_i32, %c0_i32_0 : i32, i32
  }
  func.func @transform_3(%arg0: i32) -> (i32, i32) {
    %c0_i32 = arith.constant 0 : i32
    %c0_i32_0 = arith.constant 0 : i32
    %c0_i32_1 = arith.constant 0 : i32
    return %c0_i32, %c0_i32_0 : i32, i32
  }
  func.func @transform_4(%arg0: i32) -> (i32, i32) {
    %c0_i32 = arith.constant 0 : i32
    %c0_i32_0 = arith.constant 0 : i32
    %c0_i32_1 = arith.constant 0 : i32
    return %c0_i32, %c0_i32_0 : i32, i32
  }
  func.func @transform_5(%arg0: i32) -> (i32, i32) {
    %c0_i32 = arith.constant 0 : i32
    %c0_i32_0 = arith.constant 0 : i32
    %c0_i32_1 = arith.constant 0 : i32
    return %c0_i32, %c0_i32_0 : i32, i32
  }
  func.func @transform_6(%arg0: i32) -> (i32, i32) {
    %c0_i32 = arith.constant 0 : i32
    %c0_i32_0 = arith.constant 0 : i32
    %c0_i32_1 = arith.constant 0 : i32
    return %c0_i32, %c0_i32_0 : i32, i32
  }
  func.func @transform_7(%arg0: i32) -> (i32, i32) {
    %c0_i32 = arith.constant 0 : i32
    %c0_i32_0 = arith.constant 0 : i32
    %c0_i32_1 = arith.constant 0 : i32
    return %c0_i32, %c0_i32_0 : i32, i32
  }
  func.func @transform_8(%arg0: i32) -> (i32, i32) {
    %c0_i32 = arith.constant 0 : i32
    %c0_i32_0 = arith.constant 0 : i32
    %c0_i32_1 = arith.constant 0 : i32
    return %c0_i32, %c0_i32_0 : i32, i32
  }
  func.func @transform_9(%arg0: i32) -> (i32, i32) {
    %c0_i32 = arith.constant 0 : i32
    %c0_i32_0 = arith.constant 0 : i32
    %c0_i32_1 = arith.constant 0 : i32
    return %c0_i32, %c0_i32_0 : i32, i32
  }
  func.func @transform_10(%arg0: i32) -> (i32, i32) {
    %c0_i32 = arith.constant 0 : i32
    %c0_i32_0 = arith.constant 0 : i32
    %c0_i32_1 = arith.constant 0 : i32
    return %c0_i32, %c0_i32_0 : i32, i32
  }
  func.func @transform_11(%arg0: i32) -> (i32, i32) {
    %c0_i32 = arith.constant 0 : i32
    %c0_i32_0 = arith.constant 0 : i32
    %c0_i32_1 = arith.constant 0 : i32
    return %c0_i32, %c0_i32_0 : i32, i32
  }
  func.func @transform_12(%arg0: i32) -> (i32, i32) {
    %c0_i32 = arith.constant 0 : i32
    %c0_i32_0 = arith.constant 0 : i32
    %c0_i32_1 = arith.constant 0 : i32
    return %c0_i32, %c0_i32_0 : i32, i32
  }
  func.func @transform_13(%arg0: i32) -> (i32, i32) {
    %c0_i32 = arith.constant 0 : i32
    %c0_i32_0 = arith.constant 0 : i32
    %c0_i32_1 = arith.constant 0 : i32
    return %c0_i32, %c0_i32_0 : i32, i32
  }
  func.func @transform_14(%arg0: i32) -> (i32, i32) {
    %c0_i32 = arith.constant 0 : i32
    %c0_i32_0 = arith.constant 0 : i32
    %c0_i32_1 = arith.constant 0 : i32
    return %c0_i32, %c0_i32_0 : i32, i32
  }
  func.func @transform_15(%arg0: i32) -> (i32, i32) {
    %c0_i32 = arith.constant 0 : i32
    %c0_i32_0 = arith.constant 0 : i32
    %c0_i32_1 = arith.constant 0 : i32
    return %c0_i32, %c0_i32_0 : i32, i32
  }
  func.func @transform_16(%arg0: i32) -> (i32, i32) {
    %c0_i32 = arith.constant 0 : i32
    %c0_i32_0 = arith.constant 0 : i32
    %c0_i32_1 = arith.constant 0 : i32
    return %c0_i32, %c0_i32_0 : i32, i32
  }
  func.func @transform_17(%arg0: i32) -> (i32, i32) {
    %c0_i32 = arith.constant 0 : i32
    %c0_i32_0 = arith.constant 0 : i32
    %c0_i32_1 = arith.constant 0 : i32
    return %c0_i32, %c0_i32_0 : i32, i32
  }
  func.func @transform_18(%arg0: i32) -> (i32, i32) {
    %c0_i32 = arith.constant 0 : i32
    %c0_i32_0 = arith.constant 0 : i32
    %c0_i32_1 = arith.constant 0 : i32
    return %c0_i32, %c0_i32_0 : i32, i32
  }
  func.func @transform_19(%arg0: i32) -> (i32, i32) {
    %c0_i32 = arith.constant 0 : i32
    %c0_i32_0 = arith.constant 0 : i32
    %c0_i32_1 = arith.constant 0 : i32
    return %c0_i32, %c0_i32_0 : i32, i32
  }
  func.func @transform_20(%arg0: i32) -> (i32, i32) {
    %c0_i32 = arith.constant 0 : i32
    %c0_i32_0 = arith.constant 0 : i32
    %c0_i32_1 = arith.constant 0 : i32
    return %c0_i32, %c0_i32_0 : i32, i32
  }
  func.func @transform_21(%arg0: i32) -> (i32, i32) {
    %c0_i32 = arith.constant 0 : i32
    %c0_i32_0 = arith.constant 0 : i32
    return %arg0, %c0_i32 : i32, i32
  }
}

</mosaic_0001>

<bundles_post_ra>
// kernel: autoencoder_forward.1
= control target key start
LH: loop header
LB: loop body
LE: loop exit
PB: predicated region body
PF: predicated region fallthrough
CT: control target
= control target key end

     0   :  { %s1686_s0 = inlined_call_operand.vmem [shape: f32[16,200], index: 0, kind: input, shape index: {}]   ;;  %s1687_s1 = inlined_call_operand.vmem [shape: bf16[200,128], index: 1, kind: input, shape index: {}]   ;;  %s1688_s2 = inlined_call_operand.vmem [shape: f32[1,128], index: 2, kind: input, shape index: {}]   ;;  %s1689_s3 = inlined_call_operand.vmem [shape: bf16[128,64], index: 3, kind: input, shape index: {}]   ;;  %s1690_s4 = inlined_call_operand.vmem [shape: f32[1,64], index: 4, kind: input, shape index: {}]   ;;  %s1691_s5 = inlined_call_operand.vmem [shape: bf16[64,32], index: 5, kind: input, shape index: {}]   ;;  %s1692_s6 = inlined_call_operand.vmem [shape: f32[1,32], index: 6, kind: input, shape index: {}]   ;;  %s1693_s7 = inlined_call_operand.vmem [shape: bf16[32,16], index: 7, kind: input, shape index: {}]   ;;  %s1694_s8 = inlined_call_operand.vmem [shape: f32[1,16], index: 8, kind: input, shape index: {}]   ;;  %s1695_s9 = inlined_call_operand.vmem [shape: bf16[16,12], index: 9, kind: input, shape index: {}]   ;;  %s1696_s10 = inlined_call_operand.vmem [shape: f32[1,12], index: 10, kind: input, shape index: {}]   ;;  %s1697_s11 = inlined_call_operand.vmem [shape: bf16[12,16], index: 11, kind: input, shape index: {}]   ;;  %s1698_s12 = inlined_call_operand.vmem [shape: f32[1,16], index: 12, kind: input, shape index: {}]   ;;  %s1699_s13 = inlined_call_operand.vmem [shape: bf16[16,32], index: 13, kind: input, shape index: {}]   ;;  %s1700_s14 = inlined_call_operand.vmem [shape: f32[1,32], index: 14, kind: input, shape index: {}]   ;;  %s1701_s15 = inlined_call_operand.vmem [shape: bf16[32,64], index: 15, kind: input, shape index: {}]   ;;  %s1702_s16 = inlined_call_operand.vmem [shape: f32[1,64], index: 16, kind: input, shape index: {}]   ;;  %s1703_s17 = inlined_call_operand.vmem [shape: bf16[64,128], index: 17, kind: input, shape index: {}]   ;;  %s1704_s18 = inlined_call_operand.vmem [shape: f32[1,128], index: 18, kind: input, shape index: {}]   ;;  %s1705_s19 = inlined_call_operand.vmem [shape: bf16[128,200], index: 19, kind: input, shape index: {}]   ;;  %s1706_s20 = inlined_call_operand.vmem [shape: f32[1,200], index: 20, kind: input, shape index: {}]   ;;  %s1707_s21 = inlined_call_operand.hbm [shape: f32[16,200], index: 21, kind: output, shape index: {}]  }
   0x1   :  { %1712 = sst [smem:[#allocation5_spill]] %s1686_s0 }
   0x2   :  { %1713 = sst [smem:[#allocation6_spill]] %s1687_s1 }
   0x3   :  { %1714 = sst [smem:[#allocation7_spill]] %s1688_s2 }
   0x4   :  { %1715 = sst [smem:[#allocation8_spill]] %s1689_s3 }
   0x5   :  { %1716 = sst [smem:[#allocation9_spill]] %s1690_s4 }
   0x6   :  { %1717 = sst [smem:[#allocation10_spill]] %s1691_s5 }
   0x7   :  { %s1718_s26 = sld [smem:[#allocation6_spill]]  ;;  %v1298_v1 = vmov 0   ;;  %v1299_v3 = vmov 0.0   ;;  %s1719_s22 = sld [smem:[#allocation5_spill]]  ;;  %vm183_vm0 = vcmask 588800  }
   0x8   :  { %191 = vmatprep.subr.bf16.mxu0 %v1298_v1  ;;  %1130 = vmatprep.subr.bf16.mxu1 %v1299_v3  ;;  %s1720_s3 = sld [smem:[#allocation8_spill]] }
   0xd   :  { %v1214_v0 = vld [vmem:[%s1718_s26] sm:$0xff]   ;;  %v1215_v2 = vld [vmem:[%s1718_s26 + $0x8] sm:$0xff]   ;;  %v1216_v4 = vld [vmem:[%s1718_s26 + $0x10] sm:$0xff]  }
   0xe   :  { %192 = vmatpush1.bf16.msra.mxu0 %v1214_v0  ;;  %v1217_v5 = vld [vmem:[%s1718_s26 + $0x18] sm:$0xff]   ;;  %v71_v6 = vld [vmem:[%s1719_s22 + $0x8] sm:$0xff]  ;;  %v1218_v7 = vld [vmem:[%s1718_s26 + $0x20] sm:$0xff]  }
   0xf   :  { %193 = vmatprep.subr.bf16.mxu0 %v1298_v1  ;;  %v73_v8 = vld [vmem:[%s1719_s22 + $0x18] sm:$0xff]  ;;  %v1227_v10 = vld [vmem:[%s1720_s3] sm:$0xff]   ;;  %v1228_v11 = vld [vmem:[%s1720_s3 + $0x8] sm:$0xff]  }
  0x10   :  { %v75_v9 = vpack.c.bf16 %v73_v8, %v71_v6  ;;  %1131 = vmatpush3.bf16.msra.mxu1 %v1227_v10  ;;  %v1219_v12 = vld [vmem:[%s1718_s26 + $0x28] sm:$0xff]   ;;  %v1220_v13 = vld [vmem:[%s1718_s26 + $0x30] sm:$0xff]   ;;  %v1230_v15 = vld [vmem:[%s1720_s3 + $0x18] sm:$0xff]  }
  0x11   :  { %1132 = vmatprep.subr.bf16.mxu1 %v1299_v3  ;;  %v1229_v14 = vld [vmem:[%s1720_s3 + $0x10] sm:$0xff]   ;;  %v1221_v16 = vld [vmem:[%s1718_s26 + $0x38] sm:$0xff]   ;;  %v1231_v17 = vld [vmem:[%s1720_s3 + $0x20] sm:$0xff]  }
  0x12   :  { %194 = vmatpush1.bf16.msra.mxu0 %v1215_v2  ;;  %1044 = vmatprep.mubr.msk.bf16.mxu0 %vm183_vm0, %v75_v9  ;;  %v1222_v18 = vld [vmem:[%s1718_s26 + $0x40] sm:$0xff]   ;;  %v1232_v19 = vld [vmem:[%s1720_s3 + $0x28] sm:$0xff]  }
  0x13   :  { %195 = vmatprep.subr.bf16.mxu0 %v1298_v1  ;;  %v1223_v20 = vld [vmem:[%s1718_s26 + $0x48] sm:$0xff]  }
  0x14   :  { %1133 = vmatpush3.bf16.msra.mxu1 %v1228_v11 }
  0x15   :  { %1134 = vmatprep.subr.bf16.mxu1 %v1299_v3 }
  0x16   :  { %196 = vmatpush1.bf16.msra.mxu0 %v1216_v4 }
  0x17   :  { %197 = vmatprep.subr.bf16.mxu0 %v1298_v1 }
  0x18   :  { %1135 = vmatpush3.bf16.msra.mxu1 %v1229_v14 }
  0x19   :  { %1136 = vmatprep.subr.bf16.mxu1 %v1299_v3 }
  0x1a   :  { %198 = vmatpush1.bf16.msra.mxu0 %v1217_v5 }
  0x1b   :  { %199 = vmatprep.subr.bf16.mxu0 %v1298_v1 }
  0x1c   :  { %1137 = vmatpush3.bf16.msra.mxu1 %v1230_v15 }
  0x1d   :  { %1138 = vmatprep.subr.bf16.mxu1 %v1299_v3 }
  0x1e   :  { %200 = vmatpush1.bf16.msra.mxu0 %v1218_v7 }
  0x1f   :  { %201 = vmatprep.subr.bf16.mxu0 %v1298_v1 }
  0x20   :  { %1139 = vmatpush3.bf16.msra.mxu1 %v1231_v17 }
  0x21   :  { %1140 = vmatprep.subr.bf16.mxu1 %v1299_v3 }
  0x22   :  { %202 = vmatpush1.bf16.msra.mxu0 %v1219_v12 }
  0x23   :  { %203 = vmatprep.subr.bf16.mxu0 %v1298_v1 }
  0x24   :  { %1141 = vmatpush3.bf16.msra.mxu1 %v1232_v19 }
  0x25   :  { %1142 = vmatprep.subr.bf16.mxu1 %v1299_v3 }
  0x26   :  { %204 = vmatpush1.bf16.msra.mxu0 %v1220_v13 }
  0x27   :  { %205 = vmatprep.subr.bf16.mxu0 %v1298_v1 }
  0x2a   :  { %206 = vmatpush1.bf16.msra.mxu0 %v1221_v16 }
  0x2b   :  { %207 = vmatprep.subr.bf16.mxu0 %v1298_v1 }
  0x2e   :  { %208 = vmatpush1.bf16.msra.mxu0 %v1222_v18 }
  0x2f   :  { %209 = vmatprep.subr.bf16.mxu0 %v1298_v1 }
  0x30   :  { %26 = vsyncpa [#allocation3], 0  ;;  %v1224_v21 = vld [vmem:[%s1718_s26 + $0x50] sm:$0xff]   ;;  %v1225_v22 = vld [vmem:[%s1718_s26 + $0x58] sm:$0xff]   ;;  %vm187_vm1 = vcmask 1043456   ;;  %vm1300_vm2 = vmmov 0  }
  0x31   :  { %v1226_v23 = vld [vmem:[%s1718_s26 + $0x60] ss:$0 sps:$4 sm:$0xff]   ;;  %v72_v25 = vld [vmem:[%s1719_s22 + $0x10] sm:$0xff]  ;;  %v1234_v29 = vld [vmem:[%s1720_s3 + $0x38] sm:$0xff]   ;;  %1146 = vmatprep.mubr.msk.bf16.mxu1 %vm1300_vm2, %v1299_v3  ;;  %s1721_s25 = sld [smem:[#allocation7_spill]]  ;;  %s1722_s28 = sld [smem:[#allocation10_spill]] }
  0x32   :  { %210 = vmatpush1.bf16.msra.mxu0 %v1223_v20  ;;  %v70_v24 = vld [vmem:[%s1719_s22] sm:$0xff]  ;;  %v189_v26 = vsel %vm187_vm1, %v1226_v23, 0  ;;  %v1233_v28 = vld [vmem:[%s1720_s3 + $0x30] sm:$0xff]   ;;  %s1723_s24 = sld [smem:[#allocation9_spill]]  ;;  %vm389_vm3 = vcmask 523264   ;;  %v1240_v55 = vld [vmem:[%s1693_s7 + $0x8] sm:$0xff]  }
  0x33   :  { %211 = vmatprep.subr.bf16.mxu0 %v1298_v1  ;;  %v74_v27 = vpack.c.bf16 %v72_v25, %v70_v24  ;;  %1143 = vmatpush3.bf16.msra.mxu1 %v1233_v28  ;;  %v1239_v54 = vld [vmem:[%s1693_s7] sm:$0xff]   ;;  %vm460_vm4 = vcmask 261120   ;;  %vm523_vm5 = vcmask 130048   ;;  %vm589_vm6 = vcmask 1045504  }
  0x34   :  { %1144 = vmatprep.subr.bf16.mxu1 %v1299_v3  ;;  %v1054_v56 = vld [vmem:[%s1692_s6] ss:$0 sm:$0xff]  ;;  %vm585_vm7 = vcmask 97280  }
  0x35   :  { %v1241_v4 = vld [vmem:[%s1695_s9] sm:$0xff]  }
  0x36   :  { %212 = vmatpush1.bf16.msra.mxu0 %v1224_v21  ;;  %v1060_v5 = vld [vmem:[%s1694_s8] ss:$0 sm:$0xff] }
  0x37   :  { %213 = vmatprep.subr.bf16.mxu0 %v1298_v1  ;;  %1145 = vmatpush3.bf16.msra.mxu1 %v1234_v29  ;;  %v1030_v30 = vld [vmem:[%s1721_s25] ss:$0 sm:$0xff]  ;;  %v1236_v41 = vld [vmem:[%s1722_s28 + $0x8] sm:$0xff]   ;;  %v1237_v42 = vld [vmem:[%s1722_s28 + $0x10] sm:$0xff]  }
  0x38   :  { %1150 = vmatprep.subr.bf16.mxu1 %v1299_v3  ;;  %v1235_v39 = vld [vmem:[%s1722_s28] sm:$0xff]   ;;  %v1238_v43 = vld [vmem:[%s1722_s28 + $0x18] sm:$0xff]  }
  0x39   :  { %v1045_v44 = vld [vmem:[%s1723_s24] ss:$0 sm:$0xff] }
  0x3a   :  { %214 = vmatpush1.bf16.msra.mxu0 %v1225_v22  ;;  %v1242_v15 = vld [vmem:[%s1697_s11] sm:$0x3f]  }
  0x3b   :  { %215 = vmatprep.subr.bf16.mxu0 %v1298_v1  ;;  %v591_v16 = vsel %vm589_vm6, %v1242_v15, 0  ;;  %v1064_v17 = vld [vmem:[%s1696_s10] ss:$0 sm:$0xff]  ;;  %v1271_v15 = vld [vmem:[%s1705_s19 + $0x70] ss:$8 sps:$4 sm:$0xff]  }
  0x3c   :  { %v1067_v28 = vld [vmem:[%s1698_s12] ss:$0 sm:$0xff] }
  0x3e   :  { %216 = vmatpush1.bf16.msra.mxu0 %v189_v26 }
  0x3f   :  { %1162 = vmatprep.subr.bf16.mxu0 %v1299_v3 }
  0x41   :  { %224 = vmatmul.mubr.bf16.vlgmr.msra.gmra.mrb[0].mxu0 %v74_v27  ;;  %v1243_v27 = vld [vmem:[%s1699_s13] sm:$0xff]  }
  0x42   :  { %1166 = vmatprep.mubr.msk.bf16.mxu0 %vm1300_vm2, %v1299_v3  ;;  %1163 = vmatpush3.bf16.msra.mxu0 %v1239_v54  ;;  %v1250_v54 = vld [vmem:[%s1705_s19] ss:$8 sps:$4 sm:$0xff]  }
  0x43   :  { %1164 = vmatprep.subr.bf16.mxu0 %v1299_v3 }
  0x46   :  { %1165 = vmatpush3.bf16.msra.mxu0 %v1240_v55  ;;  %v1255_v55 = vld [vmem:[%s1705_s19 + $0x14] ss:$8 sps:$4 sm:$0xff]  }
  0x47   :  { %1170 = vmatprep.subr.bf16.mxu0 %v1299_v3 }
 0x114   :  { %v225_v31 = vpop.f32.mrb[0].mxu0 }
 0x115   :  { %v226_v32 = vadd.f32 %v1030_v30, %v225_v31  ;;  %v227_v33 = vpop.f32.mrb[1].mxu0 }
 0x116   :  { %v228_v34 = vpop.f32.mrb[2].mxu0 }
 0x117   :  { %v229_v35 = vadd.f32 %v1030_v30, %v228_v34  ;;  %v230_v36 = vpop.f32.mrb[3].mxu0  ;;  %v232_v37 = vmax.f32 %v226_v32, 0.0 }
 0x119   :  { %v233_v38 = vmax.f32 %v229_v35, 0.0 }
 0x11b   :  { %v234_v40 = vpack.c.bf16 %v233_v38, %v232_v37  ;;  %v1244_v38 = vld [vmem:[%s1701_s15] sm:$0xff]  }
 0x11d   :  { %1147 = vmatmul.mubr.bf16.vlgmr.msra.gmra.mrb[0].mxu1 %v234_v40  ;;  %v1246_v40 = vld [vmem:[%s1703_s17] sm:$0xff]  }
 0x11e   :  { %1151 = vmatpush3.bf16.msra.mxu1 %v1235_v39  ;;  %1158 = vmatprep.mubr.msk.bf16.mxu1 %vm1300_vm2, %v1299_v3  ;;  %v1245_v39 = vld [vmem:[%s1701_s15 + $0x8] sm:$0xff]  }
 0x11f   :  { %1152 = vmatprep.subr.bf16.mxu1 %v1299_v3 }
 0x122   :  { %1153 = vmatpush3.bf16.msra.mxu1 %v1236_v41  ;;  %v1247_v41 = vld [vmem:[%s1703_s17 + $0x8] sm:$0xff]  }
 0x123   :  { %1154 = vmatprep.subr.bf16.mxu1 %v1299_v3 }
 0x126   :  { %1155 = vmatpush3.bf16.msra.mxu1 %v1237_v42  ;;  %v1070_v42 = vld [vmem:[%s1700_s14] ss:$0 sm:$0xff] }
 0x127   :  { %1156 = vmatprep.subr.bf16.mxu1 %v1299_v3 }
 0x12a   :  { %1157 = vmatpush3.bf16.msra.mxu1 %v1238_v43 }
 0x12b   :  { %1176 = vmatprep.subr.bf16.mxu1 %v1299_v3 }
 0x1f0   :  { %v340_v45 = vpop.f32.mrb[0].mxu1 }
 0x1f1   :  { %v341_v46 = vadd.f32 %v1045_v44, %v340_v45  ;;  %v1148_v47 = vpop.f32.mrb[1].mxu1 }
 0x1f2   :  { %v343_v48 = vpop.f32.mrb[2].mxu1 }
 0x1f3   :  { %v344_v49 = vadd.f32 %v1045_v44, %v343_v48  ;;  %v1149_v50 = vpop.f32.mrb[3].mxu1  ;;  %v347_v51 = vmax.f32 %v341_v46, 0.0 }
 0x1f5   :  { %v348_v52 = vmax.f32 %v344_v49, 0.0 }
 0x1f7   :  { %v349_v53 = vpack.c.bf16 %v348_v52, %v347_v51  ;;  %v1248_v52 = vld [vmem:[%s1703_s17 + $0x10] sm:$0xff]  }
 0x1f9   :  { %1159 = vmatmul.mubr.msk.bf16.vlgmr.msra.gmra.mrb[4].mxu1 %vm389_vm3, %v349_v53  ;;  %v1249_v53 = vld [vmem:[%s1703_s17 + $0x18] sm:$0xff]  }
 0x1fa   :  { %1178 = vmatprep.mubr.msk.bf16.mxu1 %vm1300_vm2, %v1299_v3  ;;  %1177 = vmatpush3.bf16.msra.mxu1 %v591_v16  ;;  %v1077_v16 = vld [vmem:[%s1704_s18] ss:$0 sm:$0xff]  ;;  %s1301_s18 = smov [#allocation2]  }
 0x1fb   :  { %1188 = vmatprep.subr.bf16.mxu1 %v1299_v3  ;;  %s1019_s10 = sshll.u32 %s1301_s18, 4  ;;  %s1020_s10 = int_to_ptr.vmem [resolvable:$true] %s1019_s10 }
 0x1fc   :  { %p1279_p1 = scmp.lt.s32.totalorder %s1020_s10, %s1020_s10 }
 0x2cc   :  { %v427_v57 = vpop.f32.mrb[4].mxu1 }
 0x2cd   :  { %v428_v58 = vadd.f32 %v1054_v56, %v427_v57  ;;  %v1160_v59 = vpop.f32.mrb[5].mxu1  ;;  %v1256_v57 = vld [vmem:[%s1705_s19 + $0x20] ss:$8 sps:$4 sm:$0xff]  }
 0x2ce   :  { %v430_v60 = vpop.f32.mrb[6].mxu1  ;;  %v1259_v59 = vld [vmem:[%s1705_s19 + $0x30] ss:$8 sps:$4 sm:$0xff]  }
 0x2cf   :  { %v431_v61 = vadd.f32 %v1054_v56, %v430_v60  ;;  %v1161_v62 = vpop.f32.mrb[7].mxu1  ;;  %v434_v63 = vmax.f32 %v428_v58, 0.0  ;;  %v1258_v56 = vld [vmem:[%s1705_s19 + $0x24] ss:$8 sps:$4 sm:$0xff]   ;;  %v1261_v58 = vld [vmem:[%s1705_s19 + $0x34] ss:$8 sps:$4 sm:$0xff]  }
 0x2d0   :  { %v1264_v60 = vld [vmem:[%s1705_s19 + $0x44] ss:$8 sps:$4 sm:$0xff]   ;;  %v1267_v62 = vld [vmem:[%s1705_s19 + $0x54] ss:$8 sps:$4 sm:$0xff]  }
 0x2d1   :  { %v435_v0 = vmax.f32 %v431_v61, 0.0  ;;  %v1262_v61 = vld [vmem:[%s1705_s19 + $0x40] ss:$8 sps:$4 sm:$0xff]  }
 0x2d3   :  { %v436_v2 = vpack.c.bf16 %v435_v0, %v434_v63  ;;  %v1265_v63 = vld [vmem:[%s1705_s19 + $0x50] ss:$8 sps:$4 sm:$0xff]   ;;  %v1073_v0 = vld [vmem:[%s1702_s16] ss:$0 sm:$0xff] }
 0x2d5   :  { %1167 = vmatmul.mubr.msk.bf16.vlgmr.msra.gmra.mrb[4].mxu0 %vm460_vm4, %v436_v2 }
 0x2d6   :  { %1172 = vmatprep.mubr.msk.bf16.mxu0 %vm1300_vm2, %v1299_v3  ;;  %1171 = vmatpush3.bf16.msra.mxu0 %v1241_v4 }
 0x2d7   :  { %1182 = vmatprep.subr.bf16.mxu0 %v1299_v3 }
 0x3a8   :  { %v498_v6 = vpop.f32.mrb[4].mxu0 }
 0x3a9   :  { %v499_v7 = vadd.f32 %v1060_v5, %v498_v6  ;;  %v1168_v8 = vpop.f32.mrb[5].mxu0 }
 0x3aa   :  { %v501_v9 = vpop.f32.mrb[6].mxu0 }
 0x3ab   :  { %v502_v10 = vadd.f32 %v1060_v5, %v501_v9  ;;  %v1169_v11 = vpop.f32.mrb[7].mxu0  ;;  %v505_v12 = vmax.f32 %v499_v7, 0.0 }
 0x3ad   :  { %v506_v13 = vmax.f32 %v502_v10, 0.0 }
 0x3af   :  { %v507_v14 = vpack.c.bf16 %v506_v13, %v505_v12  ;;  %v1270_v12 = vld [vmem:[%s1705_s19 + $0x64] ss:$8 sps:$4 sm:$0xff]   ;;  %v1268_v13 = vld [vmem:[%s1705_s19 + $0x60] ss:$8 sps:$4 sm:$0xff]  }
 0x3b1   :  { %1173 = vmatmul.mubr.msk.bf16.vlgmr.msra.gmra.mrb[8].mxu0 %vm523_vm5, %v507_v14  ;;  %v1273_v14 = vld [vmem:[%s1705_s19 + $0x74] ss:$8 sps:$4 sm:$0xff]  }
 0x3b2   :  { %1184 = vmatprep.mubr.msk.bf16.mxu0 %vm1300_vm2, %v1299_v3  ;;  %1183 = vmatpush3.bf16.msra.mxu0 %v1243_v27 }
 0x3b3   :  { %1196 = vmatprep.subr.bf16.mxu0 %v1299_v3 }
 0x484   :  { %v561_v18 = vpop.f32.mrb[8].mxu0 }
 0x485   :  { %v562_v19 = vadd.f32 %v1064_v17, %v561_v18  ;;  %v1174_v20 = vpop.f32.mrb[9].mxu0 }
 0x486   :  { %v564_v21 = vpop.f32.mrb[10].mxu0 }
 0x487   :  { %v565_v22 = vadd.f32 %v1064_v17, %v564_v21  ;;  %v1175_v23 = vpop.f32.mrb[11].mxu0  ;;  %v568_v24 = vmax.f32 %v562_v19, 0.0 }
 0x489   :  { %v569_v25 = vmax.f32 %v565_v22, 0.0 }
 0x48b   :  { %v570_v26 = vpack.c.bf16 %v569_v25, %v568_v24 }
 0x48d   :  { %1179 = vmatmul.mubr.msk.bf16.vlgmr.msra.gmra.mrb[8].mxu1 %vm585_vm7, %v570_v26  ;;  %v873_v26 = vlaneseq }
 0x48e   :  { %1192 = vmatprep.mubr.msk.bf16.mxu1 %vm1300_vm2, %v1299_v3  ;;  %1189 = vmatpush3.bf16.msra.mxu1 %v1244_v38 }
 0x48f   :  { %1190 = vmatprep.subr.bf16.mxu1 %v1299_v3  ;;  %v874_v27 = vshrl.u32 %v873_v26, 7 }
 0x492   :  { %1191 = vmatpush3.bf16.msra.mxu1 %v1245_v39 }
 0x560   :  { %v627_v29 = vpop.f32.mrb[8].mxu1 }
 0x561   :  { %v628_v30 = vadd.f32 %v1067_v28, %v627_v29  ;;  %v1180_v31 = vpop.f32.mrb[9].mxu1  ;;  %v871_v29 = vld [vmem:[%s1706_s20] sm:$0x3]  ;;  %s1274_s20 = scalar_lea.vmem %s1020_s10, 512 }
 0x562   :  { %v630_v32 = vpop.f32.mrb[10].mxu1  ;;  %p1275_p0 = scmp.ne.s32.totalorder %s1020_s10, %s1274_s20  ;;  %p1280_p2 = scmp.lt.s32.totalorder %s1274_s20, %s1274_s20 }
 0x563   :  { %v631_v33 = vadd.f32 %v1067_v28, %v630_v32  ;;  %v1181_v34 = vpop.f32.mrb[11].mxu1  ;;  %v634_v35 = vmax.f32 %v628_v30, 0.0  ;;  %v875_v28 = vsub.s32 0, %v874_v27  ;;  %v879_v30 = vsub.s32 1, %v874_v27 }
 0x564   :  { %p1281_p3 = por %p1280_p2, %p1279_p1 }
 0x565   :  { %v635_v36 = vmax.f32 %v631_v33, 0.0  ;;  %v876_v31 = vrot.slane %v871_v29, %v875_v28  ;;  %v880_v32 = vrot.slane %v871_v29, %v879_v30 }
 0x566   :  { %p1282_p4 = pnand %p1281_p3, %p1275_p0 }
 0x567   :  { %v636_v37 = vpack.c.bf16 %v635_v36, %v634_v35 }
 0x569   :  { %1185 = vmatmul.mubr.msk.bf16.vlgmr.msra.gmra.mrb[12].mxu0 %vm523_vm5, %v636_v37 }
 0x56a   :  { %1204 = vmatprep.mubr.msk.bf16.mxu0 %vm1300_vm2, %v1299_v3  ;;  %1197 = vmatpush3.bf16.msra.mxu0 %v1246_v40 }
 0x56b   :  { %1198 = vmatprep.subr.bf16.mxu0 %v1299_v3 }
 0x56e   :  { %1199 = vmatpush3.bf16.msra.mxu0 %v1247_v41 }
 0x56f   :  { %1200 = vmatprep.subr.bf16.mxu0 %v1299_v3 }
 0x572   :  { %1201 = vmatpush3.bf16.msra.mxu0 %v1248_v52 }
 0x573   :  { %1202 = vmatprep.subr.bf16.mxu0 %v1299_v3  ;;  %v1253_v3 = vld [vmem:[%s1705_s19 + $0x10] ss:$8 sps:$4 sm:$0xff]  }
 0x576   :  { %1203 = vmatpush3.bf16.msra.mxu0 %v1249_v53 }
 0x63c   :  { %v689_v43 = vpop.f32.mrb[12].mxu0 }
 0x63d   :  { %v690_v44 = vadd.f32 %v1070_v42, %v689_v43  ;;  %v1186_v45 = vpop.f32.mrb[13].mxu0 }
 0x63e   :  { %v692_v46 = vpop.f32.mrb[14].mxu0 }
 0x63f   :  { %v693_v47 = vadd.f32 %v1070_v42, %v692_v46  ;;  %v1187_v48 = vpop.f32.mrb[15].mxu0  ;;  %v696_v49 = vmax.f32 %v690_v44, 0.0 }
 0x641   :  { %v697_v50 = vmax.f32 %v693_v47, 0.0 }
 0x643   :  { %v698_v51 = vpack.c.bf16 %v697_v50, %v696_v49 }
 0x645   :  { %1193 = vmatmul.mubr.msk.bf16.vlgmr.msra.gmra.mrb[12].mxu1 %vm460_vm4, %v698_v51 }
 0x646   :  { %995 = vmatprep.mubr.bf16.mxu1 %v1298_v1  ;;  %v1252_v1 = vld [vmem:[%s1705_s19 + $0x4] ss:$8 sps:$4 sm:$0xff]  }
 0x647   :  { %963 = vmatprep.subr.bf16.mxu1 %v1252_v1 }
 0x648   :  { %964 = vmatpush1.bf16.msra.mxu1 %v1250_v54 }
 0x649   :  { %965 = vmatprep.subr.bf16.mxu1 %v1255_v55 }
 0x64c   :  { %966 = vmatpush1.bf16.msra.mxu1 %v1253_v3 }
 0x64d   :  { %967 = vmatprep.subr.bf16.mxu1 %v1258_v56 }
 0x650   :  { %968 = vmatpush1.bf16.msra.mxu1 %v1256_v57 }
 0x651   :  { %969 = vmatprep.subr.bf16.mxu1 %v1261_v58 }
 0x654   :  { %970 = vmatpush1.bf16.msra.mxu1 %v1259_v59 }
 0x655   :  { %971 = vmatprep.subr.bf16.mxu1 %v1264_v60 }
 0x658   :  { %972 = vmatpush1.bf16.msra.mxu1 %v1262_v61 }
 0x659   :  { %973 = vmatprep.subr.bf16.mxu1 %v1267_v62 }
 0x65c   :  { %974 = vmatpush1.bf16.msra.mxu1 %v1265_v63 }
 0x65d   :  { %975 = vmatprep.subr.bf16.mxu1 %v1270_v12 }
 0x660   :  { %976 = vmatpush1.bf16.msra.mxu1 %v1268_v13 }
 0x661   :  { %977 = vmatprep.subr.bf16.mxu1 %v1273_v14 }
 0x664   :  { %978 = vmatpush1.bf16.msra.mxu1 %v1271_v15 }
 0x718   :  { %v759_v2 = vpop.f32.mrb[12].mxu1 }
 0x719   :  { %v760_v4 = vadd.f32 %v1073_v0, %v759_v2  ;;  %v1194_v5 = vpop.f32.mrb[13].mxu1 }
 0x71a   :  { %v762_v6 = vpop.f32.mrb[14].mxu1 }
 0x71b   :  { %v763_v7 = vadd.f32 %v1073_v0, %v762_v6  ;;  %v1195_v8 = vpop.f32.mrb[15].mxu1  ;;  %v766_v9 = vmax.f32 %v760_v4, 0.0 }
 0x71d   :  { %v767_v10 = vmax.f32 %v763_v7, 0.0 }
 0x71f   :  { %v768_v11 = vpack.c.bf16 %v767_v10, %v766_v9 }
 0x721   :  { %1205 = vmatmul.mubr.msk.bf16.vlgmr.msra.gmra.mrb[16].mxu0 %vm389_vm3, %v768_v11 }
 0x7f4   :  { %v845_v17 = vpop.f32.mrb[16].mxu0 }
 0x7f5   :  { %v846_v18 = vadd.f32 %v1077_v16, %v845_v17  ;;  %v1206_v19 = vpop.f32.mrb[17].mxu0 }
 0x7f6   :  { %v848_v20 = vpop.f32.mrb[18].mxu0 }
 0x7f7   :  { %v849_v21 = vadd.f32 %v1077_v16, %v848_v20  ;;  %v1207_v22 = vpop.f32.mrb[19].mxu0  ;;  %v852_v23 = vmax.f32 %v846_v18, 0.0 }
 0x7f9   :  { %v853_v24 = vmax.f32 %v849_v21, 0.0 }
 0x7fb   :  { %v854_v25 = vpack.c.bf16 %v853_v24, %v852_v23 }
 0x7fd   :  { %996 = vmatmul.mubr.bf16.vlgmr.msra.gmra.mrb[16].mxu1 %v854_v25 }
 0x8d0   :  { %v997_v33 = vpop.f32.mrb[16].mxu1 }
 0x8d1   :  { %v998_v34 = vadd.f32 %v997_v33, %v876_v31  ;;  %v999_v35 = vpop.f32.mrb[17].mxu1 }
 0x8d2   :  { %v1000_v36 = vadd.f32 %v999_v35, %v880_v32  ;;  %v1001_v37 = vpop.f32.mrb[18].mxu1 }
 0x8d3   :  { %v1006_v38 = vmax.f32 %v998_v34, 0.0  ;;  %v1002_v39 = vadd.f32 %v1001_v37, %v876_v31  ;;  %v1003_v40 = vpop.f32.mrb[19].mxu1 }
 0x8d4   :  { %v1007_v41 = vmax.f32 %v1000_v36, 0.0  ;;  %v1004_v42 = vadd.f32 %v1003_v40, %v880_v32 }
 0x8d5   :  { %1010 = vst [vmem:[#allocation2] sm:$0xff] %v1006_v38  ;;  %v1008_v43 = vmax.f32 %v1002_v39, 0.0 }
 0x8d6   :  { %1011 = vst.msk [vmem:[#allocation2 + $0x8] sm:$0xff] %vm183_vm0, %v1007_v41  ;;  %v1009_v44 = vmax.f32 %v1004_v42, 0.0 }
 0x8d7   :  { %1012 = vst [vmem:[#allocation2 + $0x10] sm:$0xff] %v1008_v43 }
 0x8d8   :  { %1013 = vst.msk [vmem:[#allocation2 + $0x18] sm:$0xff] %vm183_vm0, %v1009_v44 }
 0x8d9   :  { %1285 = shalt.err (!%p1282_p4)
}
 0x8da   :  { %s1286_s26 = scalar_lea.hbm %s1707_s21, 512 }
 0x8db   :  { %p1287_p5 = scmp.ne.s32.totalorder %s1707_s21, %s1286_s26  ;;  %p1290_p6 = scmp.lt.u32.totalorder %s1286_s26, %s1707_s21 }
 0x8dd   :  { %p1292_p7 = pnand %p1290_p6, %p1287_p5 }
 0x8df   :  { %1295 = shalt.err (!%p1292_p7)
}
 0x8e0   :  { %s1302_s2 = smov 256   ;;  %s1303_s25 = smov 16  }
 0x8e1   :  { %1025 = dma.vmem_to_hbm [thread:$0]  %s1020_s10, 512, %s1707_s21, [#allocation3], %s1302_s2, %s1302_s2, %s1303_s25  }
 0x8e2   :  { %1296 = dma.done.wait [#allocation3], 512  }
 0x8e3   :  { %1297 = vsyncadd [#allocation3], 4294966784 }
 0x8e4   :  { %1029 = vsyncpa [#allocation3], 1 }

</bundles_post_ra>
